<compile_context>
chip_gen: v6e
topology: v6e:2x2x1
jax: 0.10.0
libtpu: 0.0.40
codegen_flags: <defaults>
</compile_context>

<pallas_src>
import functools

import jax
import jax.numpy as jnp
from jax.experimental import pallas as pl
from jax.experimental.pallas import tpu as pltpu


def _ca_kernel(x_ref, w1t_ref, w2t_ref, o_ref, sum_sc, max_sc,
               *, hw_total, tile_hw, need_mask):
    # x_ref:   (TB, C, TILE_HW)  one tile of flattened spatial data
    # w1t_ref: (C, C_red)        fc[0] weight, pre-transposed in the wrapper
    # w2t_ref: (C_red, C)        fc[2] weight, pre-transposed in the wrapper
    # o_ref:   (TB, 1, C)        lane-dense attention output
    # sum_sc / max_sc: (TB, C) f32 running accumulators (persist across HW steps)
    h = pl.program_id(1)
    nh = pl.num_programs(1)

    @pl.when(h == 0)
    def _():
        sum_sc[...] = jnp.zeros_like(sum_sc)
        max_sc[...] = jnp.full_like(max_sc, -jnp.inf)

    def _accumulate(x_sum, x_max):
        sum_sc[...] = sum_sc[...] + jnp.sum(x_sum, axis=-1, dtype=jnp.float32)
        max_sc[...] = jnp.maximum(max_sc[...],
                                  jnp.max(x_max, axis=-1).astype(jnp.float32))

    x = x_ref[...]                                           # (TB, C, TILE_HW)
    if not need_mask:
        _accumulate(x, x)
    else:
        # Only the single ragged tail tile pays for the VPU selects; all full
        # tiles take the cheap unmasked path.
        @pl.when(h < nh - 1)
        def _():
            _accumulate(x, x)

        @pl.when(h == nh - 1)
        def _():
            lane = jax.lax.broadcasted_iota(jnp.int32, (1, 1, tile_hw), 2)
            valid = (h * tile_hw + lane) < hw_total
            _accumulate(jnp.where(valid, x, jnp.zeros_like(x)),
                        jnp.where(valid, x, jnp.full_like(x, -jnp.inf)))

    @pl.when(h == nh - 1)
    def _():
        avg = sum_sc[...] * jnp.float32(1.0 / hw_total)      # (TB, C) f32
        mx = max_sc[...]                                     # (TB, C) f32
        w1t = w1t_ref[...]                                   # (C, C_red)
        w2t = w2t_ref[...]                                   # (C_red, C)
        if w1t.dtype != jnp.float32:
            # Feed the MXU native low-precision operands (f32 accumulate).
            avg = avg.astype(w1t.dtype)
            mx = mx.astype(w1t.dtype)
        # fc(avg) + fc(max) == (relu(avg@W1ᵀ) + relu(max@W1ᵀ)) @ W2ᵀ  (fc[2] is
        # linear & bias-free), so no concatenate / slicing is needed.
        hid = (jnp.maximum(jnp.dot(avg, w1t, preferred_element_type=jnp.float32), 0.0)
               + jnp.maximum(jnp.dot(mx, w1t, preferred_element_type=jnp.float32), 0.0))
        if w2t.dtype != jnp.float32:
            hid = hid.astype(w2t.dtype)
        out = jax.nn.sigmoid(jnp.dot(hid, w2t, preferred_element_type=jnp.float32))
        o_ref[:, 0, :] = out.astype(o_ref.dtype)             # (TB, C)


def _vmem_config():
    """Generation-aware (tile budget, vmem_limit_bytes, likely-two-TC)."""
    cap = 64 * 1024 * 1024
    try:
        info = pltpu.get_tpu_info()
        cap = int(getattr(info, "vmem_capacity_bytes", cap))
    except Exception:
        pass
    if cap >= 96 * 1024 * 1024:
        # v5e / v6e: 128 MiB VMEM, single TensorCore per chip -> big tiles.
        return 48 * 1024 * 1024, 96 * 1024 * 1024, False
    # v7x-like (64 MiB / TensorCore, 2 TCs) or unknown: stay conservative and
    # keep >= 2 batch-group steps so the parallel axis can shard across cores.
    return 16 * 1024 * 1024, 32 * 1024 * 1024, True


def _choose_tiling(B, C, HW, dtype_bytes, budget_bytes, max_tb):
    """Jointly pick (TB, TILE_HW).

    Prefer streaming the full spatial extent per step (long contiguous DMA
    rows); only then pack several batch elements per step (TB > 1) to amortize
    per-grid-step overhead.  If HW does not fit the budget, fall back to TB=1
    and a budget-sized multiple-of-128 spatial tile (ragged tail masked
    in-kernel).  The factor 2 accounts for double-buffering of the input."""
    per_b_bytes = 2 * C * HW * dtype_bytes
    if per_b_bytes <= budget_bytes:
        tile_hw = HW
        tb = 1
        for cand in range(max(1, min(B, max_tb)), 0, -1):
            if B % cand == 0 and cand * per_b_bytes <= budget_bytes:
                tb = cand
                break
    else:
        tb = 1
        max_tile = (budget_bytes // (2 * C * dtype_bytes)) // 128 * 128
        tile_hw = max(128, max_tile)
    num_hw = pl.cdiv(HW, tile_hw)
    return tb, tile_hw, num_hw


def _make_x_spec(tb, C, tile_hw, buffered):
    idx = lambda b, h: (b, 0, h)
    if buffered:
        try:
            return pl.BlockSpec((tb, C, tile_hw), idx, pipeline_mode=pl.Buffered(3))
        except Exception:  # pipeline_mode unsupported -> default double-buffer
            pass
    return pl.BlockSpec((tb, C, tile_hw), idx)


def channel_attention(x, w1, w2, *, budget_bytes_override=None):
    """x: (B, C, H, W); w1: (C//r, C); w2: (C, C//r). Returns (B, C, 1, 1)."""
    B, C, H, W = x.shape
    HW = H * W
    c_red = w1.shape[0]
    assert jnp.issubdtype(x.dtype, jnp.floating), "float inputs only (uses -inf)"

    x_flat = x.reshape(B, C, HW)
    w1t = jnp.transpose(w1)   # (C, C_red)  -- transpose in XLA, not in-kernel
    w2t = jnp.transpose(w2)   # (C_red, C)

    dtype_bytes = jnp.dtype(x.dtype).itemsize
    budget, vmem_limit, two_tc = _vmem_config()
    if budget_bytes_override is not None:
        budget = budget_bytes_override
    max_tb = max(1, B // 2) if (two_tc and B >= 2) else B
    tb, tile_hw, num_hw = _choose_tiling(B, C, HW, dtype_bytes, budget, max_tb)
    need_mask = (HW % tile_hw) != 0

    kernel = functools.partial(
        _ca_kernel, hw_total=HW, tile_hw=tile_hw, need_mask=need_mask)

    # Deeper pipelining only pays when steps are many and blocks are small.
    x_block_bytes = tb * C * tile_hw * dtype_bytes
    buffered = (num_hw >= 4) and (x_block_bytes <= (1 << 20)) \
        and (3 * x_block_bytes <= budget)
    x_spec = _make_x_spec(tb, C, tile_hw, buffered)

    w_bytes = jnp.dtype(w1.dtype).itemsize
    cost = pl.CostEstimate(
        flops=int(2 * B * C * HW + 6 * B * C * max(c_red, 1)),
        transcendentals=int(B * C),
        bytes_accessed=int(B * C * HW * dtype_bytes
                           + 2 * C * c_red * w_bytes
                           + B * C * dtype_bytes),
    )

    out = pl.pallas_call(
        kernel,
        out_shape=jax.ShapeDtypeStruct((B, 1, C), x.dtype),
        grid_spec=pltpu.PrefetchScalarGridSpec(
            num_scalar_prefetch=0,
            grid=(B // tb, num_hw),
            in_specs=[
                x_spec,
                pl.BlockSpec((C, c_red), lambda b, h: (0, 0)),
                pl.BlockSpec((c_red, C), lambda b, h: (0, 0)),
            ],
            out_specs=pl.BlockSpec((tb, 1, C), lambda b, h: (b, 0, 0)),
            scratch_shapes=[
                pltpu.VMEM((tb, C), jnp.float32),   # running sum
                pltpu.VMEM((tb, C), jnp.float32),   # running max
            ],
        ),
        compiler_params=pltpu.CompilerParams(
            dimension_semantics=("parallel", "arbitrary"),
            vmem_limit_bytes=vmem_limit,
        ),
        cost_estimate=cost,
    )(x_flat, w1t, w2t)
    return out.reshape(B, C, 1, 1)


def channel_attention_ref(x, w1, w2):
    """Pure-JAX reference mirroring the PyTorch forward."""
    avg = jnp.mean(x, axis=(2, 3))                   # (B, C)
    mx = jnp.max(x, axis=(2, 3))                     # (B, C)

    def fc(p):
        h = jnp.maximum(p @ w1.T, 0.0)               # (B, C_red)
        return h @ w2.T                              # (B, C)

    out = jax.nn.sigmoid(fc(avg) + fc(mx))
    return out[..., None, None]


if __name__ == "__main__":
    key = jax.random.PRNGKey(0)
    k1, k2, k3, k4, k5, k6 = jax.random.split(key, 6)

    # ---- Test 1: canonical small shape; whole spatial extent in one tile. ----
    B, C, H, W = 2, 32, 16, 16
    C_red = C // 16
    x = jax.random.normal(k1, (B, C, H, W), dtype=jnp.float32)
    # Conv2d(C, C_red, 1, bias=False).weight -> (C_red, C); Conv2d(C_red, C, 1) -> (C, C_red)
    w1 = jax.random.normal(k2, (C_red, C), dtype=jnp.float32) * 0.1
    w2 = jax.random.normal(k3, (C, C_red), dtype=jnp.float32) * 0.1

    out = jax.block_until_ready(channel_attention(x, w1, w2))
    ref = channel_attention_ref(x, w1, w2)
    assert out.shape == (B, C, 1, 1), out.shape
    assert jnp.allclose(out, ref, atol=1e-5, rtol=1e-5), "mismatch vs reference (test 1)"

    # ---- Test 2: odd batch + non-128-multiple HW with a tiny budget override
    # to force the multi-step / ragged-tail masked reduction path. ----
    B2, C2, H2, W2 = 3, 16, 13, 13
    C2_red = C2 // 8
    x2 = jax.random.normal(k4, (B2, C2, H2, W2), dtype=jnp.float32)
    w3 = jax.random.normal(k5, (C2_red, C2), dtype=jnp.float32) * 0.1
    w4 = jax.random.normal(k6, (C2, C2_red), dtype=jnp.float32) * 0.1

    out2 = jax.block_until_ready(
        channel_attention(x2, w3, w4, budget_bytes_override=16 * 1024))
    ref2 = channel_attention_ref(x2, w3, w4)
    assert out2.shape == (B2, C2, 1, 1), out2.shape
    assert jnp.allclose(out2, ref2, atol=1e-5, rtol=1e-5), "mismatch vs reference (test 2)"

    print("KERNEL_OK")
</pallas_src>

<mosaic_0001>
module attributes {stable_mosaic.version = 11 : i64} {
  func.func @_ca_kernel(%arg0: i32, %arg1: i32, %arg2: memref<1x32x256xf32, #tpu.memory_space<vmem>>, %arg3: memref<32x2xf32, #tpu.memory_space<vmem>>, %arg4: memref<2x32xf32, #tpu.memory_space<vmem>>, %arg5: memref<1x1x32xf32, #tpu.memory_space<vmem>>, %arg6: memref<1x32xf32, #tpu.memory_space<vmem>>, %arg7: memref<1x32xf32, #tpu.memory_space<vmem>>) attributes {dimension_semantics = [#tpu.dimension_semantics<parallel>, #tpu.dimension_semantics<arbitrary>], iteration_bounds = array<i64: 2, 1>, scalar_prefetch = 0 : i64, scratch_operands = 2 : i64, tpu.core_type = #tpu.core_type<tc>, window_params = [{transform_indices = @transform_0, window_bounds = array<i64: 1, 32, 256>}, {pipeline_mode = #tpu.pipeline_mode<synchronous>, transform_indices = @transform_1, window_bounds = array<i64: 32, 2>}, {pipeline_mode = #tpu.pipeline_mode<synchronous>, transform_indices = @transform_2, window_bounds = array<i64: 2, 32>}, {transform_indices = @transform_3, window_bounds = array<i64: 1, 1, 32>}]} {
    %c0_i32 = arith.constant 0 : i32
    %0 = arith.cmpi eq, %arg1, %c0_i32 : i32
    %1 = arith.extui %0 : i1 to i32
    %c0_i32_0 = arith.constant 0 : i32
    %2 = arith.cmpi ne, %1, %c0_i32_0 : i32
    scf.if %2 {
      %cst_14 = arith.constant 0.000000e+00 : f32
      %15 = vector.broadcast %cst_14 : f32 to vector<1x32xf32>
      %c0_15 = arith.constant 0 : index
      %c0_16 = arith.constant 0 : index
      %16 = vector.load %arg6[%c0_15, %c0_16] : memref<1x32xf32, #tpu.memory_space<vmem>>, vector<1x32xf32>
      tpu.vector_store %arg6[%c0_15, %c0_16], %15 {strides = array<i32>} : memref<1x32xf32, #tpu.memory_space<vmem>>, vector<1x32xf32>,
      %cst_17 = arith.constant 0xFF800000 : f32
      %17 = vector.broadcast %cst_17 : f32 to vector<1x32xf32>
      %c0_18 = arith.constant 0 : index
      %c0_19 = arith.constant 0 : index
      %18 = vector.load %arg7[%c0_18, %c0_19] : memref<1x32xf32, #tpu.memory_space<vmem>>, vector<1x32xf32>
      tpu.vector_store %arg7[%c0_18, %c0_19], %17 {strides = array<i32>} : memref<1x32xf32, #tpu.memory_space<vmem>>, vector<1x32xf32>,
    } else {
    }
    %c0 = arith.constant 0 : index
    %c0_1 = arith.constant 0 : index
    %c0_2 = arith.constant 0 : index
    %3 = vector.load %arg2[%c0, %c0_1, %c0_2] : memref<1x32x256xf32, #tpu.memory_space<vmem>>, vector<1x32x256xf32>
    %c0_3 = arith.constant 0 : index
    %c0_4 = arith.constant 0 : index
    %4 = vector.load %arg6[%c0_3, %c0_4] : memref<1x32xf32, #tpu.memory_space<vmem>>, vector<1x32xf32>
    %cst = arith.constant dense<0.000000e+00> : vector<1x32xf32>
    %5 = vector.multi_reduction <add>, %3, %cst [2] : vector<1x32x256xf32> to vector<1x32xf32>
    %6 = arith.addf %4, %5 : vector<1x32xf32>
    %c0_5 = arith.constant 0 : index
    %c0_6 = arith.constant 0 : index
    %7 = vector.load %arg6[%c0_5, %c0_6] : memref<1x32xf32, #tpu.memory_space<vmem>>, vector<1x32xf32>
    tpu.vector_store %arg6[%c0_5, %c0_6], %6 {strides = array<i32>} : memref<1x32xf32, #tpu.memory_space<vmem>>, vector<1x32xf32>,
    %c0_7 = arith.constant 0 : index
    %c0_8 = arith.constant 0 : index
    %8 = vector.load %arg7[%c0_7, %c0_8] : memref<1x32xf32, #tpu.memory_space<vmem>>, vector<1x32xf32>
    %cst_9 = arith.constant dense<0xFF800000> : vector<1x32xf32>
    %9 = vector.multi_reduction <maximumf>, %3, %cst_9 [2] : vector<1x32x256xf32> to vector<1x32xf32>
    %10 = arith.maximumf %8, %9 : vector<1x32xf32>
    %c0_10 = arith.constant 0 : index
    %c0_11 = arith.constant 0 : index
    %11 = vector.load %arg7[%c0_10, %c0_11] : memref<1x32xf32, #tpu.memory_space<vmem>>, vector<1x32xf32>
    tpu.vector_store %arg7[%c0_10, %c0_11], %10 {strides = array<i32>} : memref<1x32xf32, #tpu.memory_space<vmem>>, vector<1x32xf32>,
    %c0_i32_12 = arith.constant 0 : i32
    %12 = arith.cmpi eq, %arg1, %c0_i32_12 : i32
    %13 = arith.extui %12 : i1 to i32
    %c0_i32_13 = arith.constant 0 : i32
    %14 = arith.cmpi ne, %13, %c0_i32_13 : i32
    scf.if %14 {
      %c0_14 = arith.constant 0 : index
      %c0_15 = arith.constant 0 : index
      %15 = vector.load %arg6[%c0_14, %c0_15] : memref<1x32xf32, #tpu.memory_space<vmem>>, vector<1x32xf32>
      %cst_16 = arith.constant 3.906250e-03 : f32
      %16 = vector.broadcast %cst_16 : f32 to vector<1x32xf32>
      %17 = arith.mulf %15, %16 : vector<1x32xf32>
      %c0_17 = arith.constant 0 : index
      %c0_18 = arith.constant 0 : index
      %18 = vector.load %arg7[%c0_17, %c0_18] : memref<1x32xf32, #tpu.memory_space<vmem>>, vector<1x32xf32>
      %c0_19 = arith.constant 0 : index
      %c0_20 = arith.constant 0 : index
      %19 = vector.load %arg3[%c0_19, %c0_20] : memref<32x2xf32, #tpu.memory_space<vmem>>, vector<32x2xf32>
      %c0_21 = arith.constant 0 : index
      %c0_22 = arith.constant 0 : index
      %20 = vector.load %arg4[%c0_21, %c0_22] : memref<2x32xf32, #tpu.memory_space<vmem>>, vector<2x32xf32>
      %cst_23 = arith.constant dense<0.000000e+00> : vector<1x2xf32>
      %21 = tpu.matmul %17, %19, %cst_23 {dimension_numbers = #tpu.dot_dimension_numbers<[1], [0], [0], [1], [0, 0, 1, 1], [], []>} : vector<1x32xf32>, vector<32x2xf32>, vector<1x2xf32> -> vector<1x2xf32>
      %cst_24 = arith.constant 0.000000e+00 : f32
      %22 = vector.broadcast %cst_24 : f32 to vector<1x2xf32>
      %23 = arith.maximumf %21, %22 : vector<1x2xf32>
      %cst_25 = arith.constant dense<0.000000e+00> : vector<1x2xf32>
      %24 = tpu.matmul %18, %19, %cst_25 {dimension_numbers = #tpu.dot_dimension_numbers<[1], [0], [0], [1], [0, 0, 1, 1], [], []>} : vector<1x32xf32>, vector<32x2xf32>, vector<1x2xf32> -> vector<1x2xf32>
      %cst_26 = arith.constant 0.000000e+00 : f32
      %25 = vector.broadcast %cst_26 : f32 to vector<1x2xf32>
      %26 = arith.maximumf %24, %25 : vector<1x2xf32>
      %27 = arith.addf %23, %26 : vector<1x2xf32>
      %cst_27 = arith.constant dense<0.000000e+00> : vector<1x32xf32>
      %28 = tpu.matmul %27, %20, %cst_27 {dimension_numbers = #tpu.dot_dimension_numbers<[1], [0], [0], [1], [0, 0, 1, 1], [], []>} : vector<1x2xf32>, vector<2x32xf32>, vector<1x32xf32> -> vector<1x32xf32>
      %29 = arith.negf %28 : vector<1x32xf32>
      %30 = math.exp %29 : vector<1x32xf32>
      %cst_28 = arith.constant 1.000000e+00 : f32
      %31 = vector.broadcast %cst_28 : f32 to vector<1x32xf32>
      %32 = arith.addf %31, %30 : vector<1x32xf32>
      %33 = arith.divf %31, %32 : vector<1x32xf32>
      %c0_29 = arith.constant 0 : index
      %c0_30 = arith.constant 0 : index
      %c0_31 = arith.constant 0 : index
      %34 = vector.load %arg5[%c0_29, %c0_30, %c0_31] : memref<1x1x32xf32, #tpu.memory_space<vmem>>, vector<1x1x32xf32>
      %35 = vector.shape_cast %34 : vector<1x1x32xf32> to vector<1x32xf32>
      %36 = vector.shape_cast %33 : vector<1x32xf32> to vector<1x1x32xf32>
      tpu.vector_store %arg5[%c0_29, %c0_30, %c0_31], %36 {strides = array<i32>} : memref<1x1x32xf32, #tpu.memory_space<vmem>>, vector<1x1x32xf32>,
    } else {
    }
    return
  }
  func.func @transform_0(%arg0: i32, %arg1: i32) -> (i32, i32, i32) {
    %c0_i32 = arith.constant 0 : i32
    %c0_i32_0 = arith.constant 0 : i32
    return %arg0, %c0_i32, %arg1 : i32, i32, i32
  }
  func.func @transform_1(%arg0: i32, %arg1: i32) -> (i32, i32) {
    %c0_i32 = arith.constant 0 : i32
    %c0_i32_0 = arith.constant 0 : i32
    %c0_i32_1 = arith.constant 0 : i32
    return %c0_i32, %c0_i32_0 : i32, i32
  }
  func.func @transform_2(%arg0: i32, %arg1: i32) -> (i32, i32) {
    %c0_i32 = arith.constant 0 : i32
    %c0_i32_0 = arith.constant 0 : i32
    %c0_i32_1 = arith.constant 0 : i32
    return %c0_i32, %c0_i32_0 : i32, i32
  }
  func.func @transform_3(%arg0: i32, %arg1: i32) -> (i32, i32, i32) {
    %c0_i32 = arith.constant 0 : i32
    %c0_i32_0 = arith.constant 0 : i32
    %c0_i32_1 = arith.constant 0 : i32
    return %arg0, %c0_i32, %c0_i32_0 : i32, i32, i32
  }
}

</mosaic_0001>

<bundles_post_ra>
// kernel: tpu_custom_call.1
= control target key start
LH: loop header
LB: loop body
LE: loop exit
PB: predicated region body
PF: predicated region fallthrough
CT: control target
= control target key end

     0   :  { %8 = vsyncpa [#allocation5], 0  ;;  %s1948_s0 = inlined_call_operand.hbm [shape: f32[2,32,256], index: 0, kind: input, shape index: {}]   ;;  %s1949_s1 = inlined_call_operand.vmem [shape: f32[32,2], index: 1, kind: input, shape index: {}]   ;;  %s1950_s2 = inlined_call_operand.vmem [shape: f32[2,32], index: 2, kind: input, shape index: {}]   ;;  %s1951_s3 = inlined_call_operand.hbm [shape: f32[2,1,32], index: 3, kind: output, shape index: {}]  }
   0x1   :  { %10 = vsyncpa [#allocation5 + $0x1], 0 }
   0x2   :  { %11 = vsyncpa [#allocation6], 0 }
   0x3   :  { %13 = vsyncpa [#allocation6 + $0x1], 0  ;;  %s1614_s12 = smov 0   ;;  %s1616_s13 = smov 0  }
   0x4   :  { %s1618_s14 = smov 0   ;;  %s1620_s15 = smov 0  }
   0x5   :  { %s1622_s16 = smov 0   ;;  %s1624_s17 = smov 0  }
   0x6 LB: > { %s1343_s18 = sadd.s32 4294967295, %s1583_s17   ;;  %s1344_s19 = sadd.s32 4294967294, %s1583_s17   ;;  %s1583_s17 = sphi %s1624_s17, %s19_s17   ;;  %s1579_s16 = sphi %s1622_s16, %s1962_s16   ;;  %s1575_s15 = sphi %s1620_s15, %s1961_s15   ;;  %s1571_s14 = sphi %s1618_s14, %s1960_s14   ;;  %s1567_s13 = sphi %s1616_s13, %s1959_s13   ;;  %s1563_s12 = sphi %s1614_s12, %s1958_s12  }
   0x7   : > { %s31_s20 = sadd.s32 1, %s1579_s16  ;;  %s40_s21 = sadd.s32 1, %s1571_s14 }
   0x8   : > { %p33_p0 = scmp.ge.s32.totalorder %s31_s20, 2  ;;  %p47_p1 = scmp.ne.s32.totalorder %s1571_s14, %s1567_s13 }
   0x9   : > { %p48_p2 = scmp.eq.s32.totalorder %s1583_s17, 0  ;;  %p53_p3 = scmp.ne.s32.totalorder %s1567_s13, %s1563_s12 }
   0xa   : > { %s1964_s20 = smov (%p33_p0, %s31_s20), 0  ;;  %p54_p5 = scmp.eq.s32.totalorder %s1343_s18, 0 }
   0xb   : > { %p1655_p4 = por %p48_p2, %p47_p1  ;;  %s35_s23 = ssub.s32 %s1579_s16, %s1964_s20 }
   0xc   : > { %p119_p6 = scmp.eq.s32.totalorder %s1343_s18, 1  ;;  %p38_p7 = scmp.eq.s32.totalorder %s35_s23, 0 }
   0xd   : > { %p1661_p8 = por %p54_p5, %p53_p3  ;;  %p125_p10 = scmp.eq.s32.totalorder %s1344_s19, 1 }
   0xe   : > { %p1665_p9 = por %p119_p6, %p47_p1  ;;  %p1412_p13 = scmp.lt.s32.totalorder %s1583_s17, 2 }
   0xf   : > { %s1670_s26 = scalar_select %p38_p7, %s1571_s14, %s40_s21  }
  0x10   : > { %p1672_p11 = por %p125_p10, %p53_p3  ;;  %s151_s28 = sand.u32 1, %s1571_s14  }
  0x11   : > { %s1347_s29 = sshll.u32 %s151_s28, 6  ;;  %s1360_s30 = sshll.u32 %s1579_s16, 10 }
  0x12   : > { %s163_s6 = scalar_lea.hbm %s1948_s0, %s1360_s30  ;;  %s155_s7 = scalar_lea.vmem [#allocation4], %s1347_s29 }
  0x13   : > { %s164_s8 = sshll.u32 %s155_s7, 4  ;;  %p1685_p0 = pnand %p1412_p13, %p1655_p4  ;;  %s165_s8 = int_to_ptr.vmem [resolvable:$true] %s164_s8 }
  0x14   : > { %p1350_p1 = scmp.ge.s32.totalorder %s1583_s17, 1  ;;  %s152_s10 = scalar_lea.sflag [#allocation5], %s151_s28 }
  0x15   : > { %p1477_p2 = pneg %p1685_p0  ;;  %s1488_s11 = scalar_lea.vmem %s165_s8, 1024 }
  0x16   : > { %p1489_p3 = scmp.ne.s32.totalorder %s165_s8, %s1488_s11  ;;  %s1585_s18 = smov [#allocation4]  }
  0x17   : > { %s1493_s19 = sshll.u32 %s1585_s18, 4  ;;  %s1494_s19 = int_to_ptr.vmem [resolvable:$false] %s1493_s19 }
  0x18   : > { %p1491_p5 = pnand %p1489_p3, %p1477_p2  ;;  %s1495_s21 = scalar_lea.vmem %s1494_s19, 2048 }
  0x19   : > { %p1496_p7 = scmp.lt.s32.totalorder %s165_s8, %s1494_s19  ;;  %p1497_p10 = scmp.lt.s32.totalorder %s1495_s21, %s1488_s11 }
  0x1a   : > { %p1492_p6 = pneg %p1491_p5 }
  0x1b   : > { %p1498_p12 = por %p1497_p10, %p1496_p7 }
  0x1d   : > { %p1499_p4 = pnand %p1498_p12, %p1492_p6 }
  0x1f   : > { %1502 = shalt.err (!%p1499_p4)
}
  0x20   : > { %s1586_s22 = smov 256   ;;  %s1587_s23 = smov 16  }
  0x21   : > { %1407 = dma.hbm_to_vmem [thread:$0]  (!%p1685_p0), %s163_s6, 1024, %s165_s8, %s152_s10, %s1586_s22, %s1586_s22, %s1587_s23  }
  0x22   : > { %p172_p13 = scmp.lt.s32.totalorder %s1583_s17, 3 }
  0x24   : > { %p173_p2 = pnand %p1350_p1, %p172_p13 }
  0x25   : > { %s1698_s28 = sand.u32 (!%p173_p2), 1, %s1567_s13  }
  0x26   : > { %176 = sbr.rel (%p173_p2) target bundleno = 810 (0x32a), region = 32  ;;  %s1351_s29 = sshll.u32 (!%p173_p2), %s1698_s28, 6 }
  0x27   : > { %s179_s30 = scalar_lea.sflag (!%p173_p2), [#allocation5], %s1698_s28  ;;  %s182_s4 = scalar_lea.vmem (!%p173_p2), [#allocation4], %s1351_s29 }
  0x2b   : > { %1554 = dma.done.wait (%p1661_p8), %s179_s30, 1024  }
  0x2c   : > { %1556 = vsyncadd (%p1661_p8), %s179_s30, 4294966272  ;;  %v212_v0 = vld [vmem:[%s182_s4] sm:$0xff]  ;;  %v213_v1 = vld [vmem:[%s182_s4 + $0x8] sm:$0xff]  ;;  %v1588_v16 = vmov 0   ;;  %v237_v17 = vlaneseq  ;;  %v1589_v18 = vmov 1966171168  }
  0x2d   : > { %v214_v2 = vld [vmem:[%s182_s4 + $0x10] sm:$0xff]  ;;  %v221_v3 = vadd.f32 %v213_v1, %v212_v0  ;;  %v215_v4 = vld [vmem:[%s182_s4 + $0x18] sm:$0xff]  ;;  %v216_v5 = vld [vmem:[%s182_s4 + $0x20] sm:$0xff]  ;;  %v619_v12 = vmax.f32 %v212_v0, %v213_v1  ;;  %1469 = vset.pattern.permute.xlu0 %v1588_v16  ;;  %1470 = vset.pattern.permute.xlu1 %v1588_v16  ;;  %v370_v19 = vunpack.c.l.s4 %v1589_v18  ;;  %vm209_vm0 = vcmask 253952   ;;  %s1357_s21 = sshll.u32 %s1575_s15, 4  ;;  %s203_s22 = scalar_lea.vmem [#allocation7], %s1698_s28 }
  0x2e   : > { %v217_v6 = vld [vmem:[%s182_s4 + $0x28] sm:$0xff]  ;;  %v218_v8 = vld [vmem:[%s182_s4 + $0x30] sm:$0xff]  ;;  %v219_v9 = vld [vmem:[%s182_s4 + $0x38] sm:$0xff]  ;;  %v224_v10 = vadd.f32 %v215_v4, %v214_v2  ;;  %v622_v13 = vmax.f32 %v214_v2, %v215_v4  ;;  %v1707_v20 = vshrl.u32 %v237_v17, 7  ;;  %vm1592_vm1 = vmmov 0   ;;  %s1266_s23 = sshll.u32 %s203_s22, 4  ;;  %s1905_s4 = scalar_lea.hbm %s1951_s3, %s1357_s21  ;;  %s1267_s23 = int_to_ptr.vmem [resolvable:$true] %s1266_s23 }
  0x2f   : > { %v227_v7 = vadd.f32 %v217_v6, %v216_v5  ;;  %222 = vadd.xlane.f32.xlu0 %v221_v3  ;;  %v230_v11 = vadd.f32 %v219_v9, %v218_v8  ;;  %v625_v14 = vmax.f32 %v216_v5, %v217_v6  ;;  %v628_v15 = vmax.f32 %v218_v8, %v219_v9  ;;  %s1254_s24 = scalar_lea.sflag [#allocation6], %s1698_s28  ;;  %s1503_s5 = scalar_lea.vmem %s1267_s23, 16 }
  0x30   : > { %v371_v21 = vunpack.c.0.s8 %v370_v19  ;;  %v1710_v22 = vsub.s32 0, %v1707_v20  ;;  %v1713_v23 = vsub.s32 1, %v1707_v20  ;;  %v1716_v24 = vsub.s32 2, %v1707_v20  ;;  %p1504_p8 = scmp.ne.s32.totalorder %s1267_s23, %s1503_s5  ;;  %s1593_s6 = smov [#allocation7]  }
  0x31   : > { %228 = vadd.xlane.f32.xlu1 %v227_v7  ;;  %v1719_v25 = vsub.s32 3, %v1707_v20  ;;  %v1722_v26 = vsub.s32 4, %v1707_v20  ;;  %v1725_v27 = vsub.s32 5, %v1707_v20  ;;  %v1728_v28 = vsub.s32 6, %v1707_v20  ;;  %s1507_s7 = sshll.u32 %s1593_s6, 4  ;;  %s1508_s7 = int_to_ptr.vmem [resolvable:$false] %s1507_s7 }
  0x32   : > { %v1731_v29 = vsub.s32 7, %v1707_v20  ;;  %v1734_v31 = vsub.s32 %v371_v21, %v1707_v20  ;;  %vm584_vm2 = vcmask 130112   ;;  %vm591_vm3 = vcmask 195712   ;;  %p1505_p12 = pnand %p1504_p8, %p1665_p9  ;;  %s1509_s15 = scalar_lea.vmem %s1508_s7, 32 }
  0x33   : > { %225 = vadd.xlane.f32.xlu0 %v224_v10  ;;  %vm598_vm4 = vcmask 261312   ;;  %vm1018_vm5 = vcmask 261120   ;;  %vm1172_vm6 = vcmask 1041408   ;;  %vm1168_vm7 = vcmask 15360   ;;  %p1510_p1 = scmp.lt.s32.totalorder %s1267_s23, %s1508_s7  ;;  %p1511_p3 = scmp.lt.s32.totalorder %s1509_s15, %s1503_s5 }
  0x34   : > { %p1506_p0 = pneg %p1505_p12 }
  0x35   : > { %231 = vadd.xlane.f32.xlu1 %v230_v11  ;;  %p1512_p5 = por %p1511_p3, %p1510_p1 }
  0x37   : > { %620 = vmax.xlane.f32.xlu0 %v619_v12  ;;  %p1513_p6 = pnand %p1512_p5, %p1506_p0 }
  0x39   : > { %623 = vmax.xlane.f32.xlu1 %v622_v13 }
  0x3b   : > { %626 = vmax.xlane.f32.xlu0 %v625_v14 }
  0x3d   : > { %629 = vmax.xlane.f32.xlu1 %v628_v15 }
  0xb8   : > { %v223_v30 = vpop.xlane.xlu0 %222 }
  0xb9   : > { %v240_v33 = vrot.slane %v223_v30, %v1710_v22  ;;  %v244_v34 = vrot.slane %v223_v30, %v1713_v23  ;;  %v248_v35 = vrot.slane %v223_v30, %v1716_v24  ;;  %v252_v36 = vrot.slane %v223_v30, %v1719_v25 }
  0xba   : > { %v229_v32 = vpop.xlane.xlu1 %228  ;;  %v256_v37 = vrot.slane %v223_v30, %v1722_v26  ;;  %v260_v38 = vrot.slane %v223_v30, %v1725_v27  ;;  %v264_v39 = vrot.slane %v223_v30, %v1728_v28  ;;  %v268_v40 = vrot.slane %v223_v30, %v1731_v29 }
  0xbb   : > { %v365_v41 = vcombine.low %v240_v33, %v244_v34  ;;  %v366_v42 = vcombine.low %v248_v35, %v252_v36  ;;  %v304_v43 = vrot.slane %v229_v32, %v1710_v22  ;;  %v308_v44 = vrot.slane %v229_v32, %v1713_v23 }
  0xbc   : > { %v226_v45 = vpop.xlane.xlu0 %225  ;;  %v367_v46 = vcombine.low %v256_v37, %v260_v38  ;;  %v368_v47 = vcombine.low %v264_v39, %v268_v40  ;;  %v312_v48 = vrot.slane %v229_v32, %v1716_v24  ;;  %v316_v49 = vrot.slane %v229_v32, %v1719_v25 }
  0xbd   : > { %v375_v50 = vrot.slane %v365_v41, %v1734_v31  ;;  %v382_v51 = vrot.slane %v366_v42, %v1734_v31  ;;  %v272_v52 = vrot.slane %v226_v45, %v1710_v22  ;;  %v276_v53 = vrot.slane %v226_v45, %v1713_v23 }
  0xbe   : > { %v389_v54 = vrot.slane %v367_v46, %v1734_v31  ;;  %v396_v55 = vrot.slane %v368_v47, %v1734_v31  ;;  %v280_v56 = vrot.slane %v226_v45, %v1716_v24  ;;  %v284_v57 = vrot.slane %v226_v45, %v1719_v25  ;;  %v232_v6 = vpop.xlane.xlu1 %231 }
  0xbf   : > { %v397_v58 = vcombine.low %v375_v50, %v382_v51  ;;  %v288_v59 = vrot.slane %v226_v45, %v1722_v26  ;;  %v292_v60 = vrot.slane %v226_v45, %v1725_v27  ;;  %v296_v61 = vrot.slane %v226_v45, %v1728_v28 }
  0xc0   : > { %v398_v62 = vcombine.low %v389_v54, %v396_v55  ;;  %v300_v63 = vrot.slane %v226_v45, %v1731_v29  ;;  %v414_v0 = vcombine.low %v272_v52, %v276_v53  ;;  %v415_v1 = vcombine.low %v280_v56, %v284_v57  ;;  %v621_v42 = vpop.xlane.xlu0 %620 }
  0xc1   : > { %v405_v2 = vrot.slane %v397_v58, %v1734_v31  ;;  %v416_v3 = vcombine.low %v288_v59, %v292_v60  ;;  %v320_v4 = vrot.slane %v229_v32, %v1722_v26  ;;  %v324_v5 = vrot.slane %v229_v32, %v1725_v27 }
  0xc2   : > { %v412_v7 = vrot.slane %v398_v62, %v1734_v31  ;;  %v417_v8 = vcombine.low %v296_v61, %v300_v63  ;;  %v424_v9 = vrot.slane %v414_v0, %v1734_v31  ;;  %v431_v10 = vrot.slane %v415_v1, %v1734_v31  ;;  %v624_v59 = vpop.xlane.xlu1 %623 }
  0xc3   : > { %v438_v11 = vrot.slane %v416_v3, %v1734_v31  ;;  %v328_v12 = vrot.slane %v229_v32, %v1728_v28  ;;  %v332_v13 = vrot.slane %v229_v32, %v1731_v29  ;;  %v463_v14 = vcombine.low %v304_v43, %v308_v44 }
  0xc4   : > { %v413_v15 = vcombine.low %v405_v2, %v412_v7  ;;  %v445_v16 = vrot.slane %v417_v8, %v1734_v31  ;;  %v446_v18 = vcombine.low %v424_v9, %v431_v10  ;;  %v464_v19 = vcombine.low %v312_v48, %v316_v49 }
  0xc5   : > { %v465_v21 = vcombine.low %v320_v4, %v324_v5  ;;  %v466_v30 = vcombine.low %v328_v12, %v332_v13  ;;  %v473_v33 = vrot.slane %v463_v14, %v1734_v31  ;;  %v336_v34 = vrot.slane %v232_v6, %v1710_v22 }
  0xc6   : > { %562 = vperm.xlu0 %1469, %v413_v15   ;;  %v447_v35 = vcombine.low %v438_v11, %v445_v16  ;;  %v454_v36 = vrot.slane %v446_v18, %v1734_v31  ;;  %v480_v37 = vrot.slane %v464_v19, %v1734_v31  ;;  %v340_v32 = vrot.slane %v232_v6, %v1713_v23 }
  0xc7   : > { %v487_v38 = vrot.slane %v465_v21, %v1734_v31  ;;  %v494_v39 = vrot.slane %v466_v30, %v1734_v31  ;;  %v344_v40 = vrot.slane %v232_v6, %v1716_v24  ;;  %v348_v41 = vrot.slane %v232_v6, %v1719_v25  ;;  %v627_v30 = vpop.xlane.xlu0 %626 }
  0xc8   : > { %v461_v43 = vrot.slane %v447_v35, %v1734_v31  ;;  %v495_v44 = vcombine.low %v473_v33, %v480_v37  ;;  %v352_v45 = vrot.slane %v232_v6, %v1722_v26  ;;  %v356_v46 = vrot.slane %v232_v6, %v1725_v27 }
  0xc9   : > { %v496_v47 = vcombine.low %v487_v38, %v494_v39  ;;  %v360_v48 = vrot.slane %v232_v6, %v1728_v28  ;;  %v364_v49 = vrot.slane %v232_v6, %v1731_v29  ;;  %v512_v50 = vcombine.low %v336_v34, %v340_v32 }
  0xca   : > { %v462_v51 = vcombine.low %v454_v36, %v461_v43  ;;  %v503_v52 = vrot.slane %v495_v44, %v1734_v31  ;;  %v513_v53 = vcombine.low %v344_v40, %v348_v41  ;;  %v514_v54 = vcombine.low %v352_v45, %v356_v46 }
  0xcb   : > { %v510_v55 = vrot.slane %v496_v47, %v1734_v31  ;;  %v515_v56 = vcombine.low %v360_v48, %v364_v49  ;;  %v522_v57 = vrot.slane %v512_v50, %v1734_v31  ;;  %v638_v58 = vrot.slane %v621_v42, %v1710_v22 }
  0xcc   : > { %565 = vperm.xlu1 %1470, %v462_v51   ;;  %v529_v60 = vrot.slane %v513_v53, %v1734_v31  ;;  %v536_v61 = vrot.slane %v514_v54, %v1734_v31  ;;  %v642_v62 = vrot.slane %v621_v42, %v1713_v23  ;;  %v646_v63 = vrot.slane %v621_v42, %v1716_v24 }
  0xcd   : > { %v511_v0 = vcombine.low %v503_v52, %v510_v55  ;;  %v543_v1 = vrot.slane %v515_v56, %v1734_v31  ;;  %v650_v2 = vrot.slane %v621_v42, %v1719_v25  ;;  %v654_v3 = vrot.slane %v621_v42, %v1722_v26  ;;  %v630_v52 = vpop.xlane.xlu1 %629 }
  0xce   : > { %v544_v4 = vcombine.low %v522_v57, %v529_v60  ;;  %v658_v5 = vrot.slane %v621_v42, %v1725_v27  ;;  %v662_v6 = vrot.slane %v621_v42, %v1728_v28  ;;  %v666_v7 = vrot.slane %v621_v42, %v1731_v29 }
  0xcf   : > { %v545_v8 = vcombine.low %v536_v61, %v543_v1  ;;  %v763_v9 = vcombine.low %v638_v58, %v642_v62  ;;  %v764_v10 = vcombine.low %v646_v63, %v650_v2  ;;  %v670_v11 = vrot.slane %v624_v59, %v1710_v22 }
  0xd0   : > { %568 = vperm.xlu1 %1470, %v511_v0   ;;  %v552_v12 = vrot.slane %v544_v4, %v1734_v31  ;;  %v765_v13 = vcombine.low %v654_v3, %v658_v5  ;;  %v766_v14 = vcombine.low %v662_v6, %v666_v7  ;;  %v674_v15 = vrot.slane %v624_v59, %v1713_v23 }
  0xd1   : > { %v559_v16 = vrot.slane %v545_v8, %v1734_v31  ;;  %v773_v18 = vrot.slane %v763_v9, %v1734_v31  ;;  %v780_v19 = vrot.slane %v764_v10, %v1734_v31  ;;  %v678_v21 = vrot.slane %v624_v59, %v1716_v24 }
  0xd2   : > { %v787_v33 = vrot.slane %v765_v13, %v1734_v31  ;;  %v794_v34 = vrot.slane %v766_v14, %v1734_v31  ;;  %v682_v35 = vrot.slane %v624_v59, %v1719_v25  ;;  %v686_v36 = vrot.slane %v624_v59, %v1722_v26 }
  0xd3   : > { %v560_v37 = vcombine.low %v552_v12, %v559_v16  ;;  %v795_v32 = vcombine.low %v773_v18, %v780_v19  ;;  %v690_v38 = vrot.slane %v624_v59, %v1725_v27  ;;  %v694_v39 = vrot.slane %v624_v59, %v1728_v28 }
  0xd4   : > { %v796_v40 = vcombine.low %v787_v33, %v794_v34  ;;  %v698_v41 = vrot.slane %v624_v59, %v1731_v29  ;;  %v812_v42 = vcombine.low %v670_v11, %v674_v15  ;;  %v813_v43 = vcombine.low %v678_v21, %v682_v35 }
  0xd5   : > { %571 = vperm.xlu1 %1470, %v560_v37   ;;  %v803_v44 = vrot.slane %v795_v32, %v1734_v31  ;;  %v814_v45 = vcombine.low %v686_v36, %v690_v38  ;;  %v702_v46 = vrot.slane %v627_v30, %v1710_v22  ;;  %v706_v47 = vrot.slane %v627_v30, %v1713_v23 }
  0xd6   : > { %v810_v48 = vrot.slane %v796_v40, %v1734_v31  ;;  %v815_v49 = vcombine.low %v694_v39, %v698_v41  ;;  %v822_v50 = vrot.slane %v812_v42, %v1734_v31  ;;  %v829_v51 = vrot.slane %v813_v43, %v1734_v31  ;;  %v1015_v39 = vld [vmem:[%s1949_s1 + $0x10] sm:$0xff]  ;;  %v1014_v43 = vld [vmem:[%s1949_s1 + $0x8] sm:$0xff] }
  0xd7   : > { %v836_v53 = vrot.slane %v814_v45, %v1734_v31  ;;  %v710_v54 = vrot.slane %v627_v30, %v1716_v24  ;;  %v714_v55 = vrot.slane %v627_v30, %v1719_v25  ;;  %v718_v56 = vrot.slane %v627_v30, %v1722_v26  ;;  %v1013_v45 = vld [vmem:[%s1949_s1] sm:$0xff] }
  0xd8   : > { %v811_v57 = vcombine.low %v803_v44, %v810_v48  ;;  %v843_v58 = vrot.slane %v815_v49, %v1734_v31  ;;  %v844_v59 = vcombine.low %v822_v50, %v829_v51  ;;  %v722_v60 = vrot.slane %v627_v30, %v1725_v27 }
  0xd9   : > { %v726_v61 = vrot.slane %v627_v30, %v1728_v28  ;;  %v730_v62 = vrot.slane %v627_v30, %v1731_v29  ;;  %v861_v63 = vcombine.low %v702_v46, %v706_v47  ;;  %v862_v0 = vcombine.low %v710_v54, %v714_v55 }
  0xda   : > { %960 = vperm.xlu1 %1470, %v811_v57   ;;  %v845_v1 = vcombine.low %v836_v53, %v843_v58  ;;  %v852_v2 = vrot.slane %v844_v59, %v1734_v31  ;;  %v863_v3 = vcombine.low %v718_v56, %v722_v60  ;;  %v734_v4 = vrot.slane %v630_v52, %v1710_v22 }
  0xdb   : > { %v864_v5 = vcombine.low %v726_v61, %v730_v62  ;;  %v871_v6 = vrot.slane %v861_v63, %v1734_v31  ;;  %v878_v7 = vrot.slane %v862_v0, %v1734_v31  ;;  %v738_v8 = vrot.slane %v630_v52, %v1713_v23 }
  0xdc   : > { %v859_v9 = vrot.slane %v845_v1, %v1734_v31  ;;  %v885_v10 = vrot.slane %v863_v3, %v1734_v31  ;;  %v742_v11 = vrot.slane %v630_v52, %v1716_v24  ;;  %v746_v12 = vrot.slane %v630_v52, %v1719_v25 }
  0xdd   : > { %v892_v13 = vrot.slane %v864_v5, %v1734_v31  ;;  %v893_v14 = vcombine.low %v871_v6, %v878_v7  ;;  %v750_v22 = vrot.slane %v630_v52, %v1722_v26  ;;  %v754_v15 = vrot.slane %v630_v52, %v1725_v27 }
  0xde   : > { %v860_v16 = vcombine.low %v852_v2, %v859_v9  ;;  %v758_v18 = vrot.slane %v630_v52, %v1728_v28  ;;  %v762_v23 = vrot.slane %v630_v52, %v1731_v29  ;;  %v910_v19 = vcombine.low %v734_v4, %v738_v8  ;;  %v1016_v29 = vld [vmem:[%s1949_s1 + $0x18] sm:$0xff] }
  0xdf   : > { %v894_v21 = vcombine.low %v885_v10, %v892_v13  ;;  %v901_v30 = vrot.slane %v893_v14, %v1734_v31  ;;  %v911_v33 = vcombine.low %v742_v11, %v746_v12  ;;  %v912_v24 = vcombine.low %v750_v22, %v754_v15 }
  0xe0   : > { %963 = vperm.xlu1 %1470, %v860_v16   ;;  %v913_v25 = vcombine.low %v758_v18, %v762_v23  ;;  %v920_v34 = vrot.slane %v910_v19, %v1734_v31  ;;  %v1590_v38 = vmov 0.0   ;;  %v1591_v41 = vmov -inf  }
  0xe1   : > { %v908_v35 = vrot.slane %v894_v21, %v1734_v31  ;;  %v927_v26 = vrot.slane %v911_v33, %v1734_v31  ;;  %v934_v27 = vrot.slane %v912_v24, %v1734_v31  ;;  %210 = vst.msk [vmem:[#allocation2] sm:$0x1] %vm209_vm0, %v1590_v38  ;;  %1373 = vmatprep.subr.mxu0 %v1590_v38  ;;  %211 = vst.msk [vmem:[#allocation3] sm:$0x1] %vm209_vm0, %v1591_v41  ;;  %v1017_v21 = vld [vmem:[%s1950_s2] sm:$0x3] }
  0xe2   : > { %v941_v28 = vrot.slane %v913_v25, %v1734_v31  ;;  %1384 = vmatprep.subr.mxu1 %v1590_v38  ;;  %1374 = vmatpush3.msra.mxu0 %v1016_v29  ;;  %v574_v46 = vand.u32 127, %v237_v17 }
  0xe3   : > { %v909_v36 = vcombine.low %v901_v30, %v908_v35  ;;  %v942_v37 = vcombine.low %v920_v34, %v927_v26  ;;  %1375 = vmatprep.subr.mxu0 %v1590_v38  ;;  %1385 = vmatpush3.msra.mxu1 %v1016_v29 }
  0xe4   : > { %v943_v32 = vcombine.low %v934_v27, %v941_v28  ;;  %1376 = vmatpush3.msra.mxu0 %v1015_v39  ;;  %1386 = vmatprep.subr.mxu1 %v1590_v38  ;;  %v579_v47 = vadd.s32 4294967288, %v574_v46  ;;  %v586_v48 = vadd.s32 4294967280, %v574_v46  ;;  %v593_v51 = vadd.s32 4294967272, %v574_v46 }
  0xe5   : > { %966 = vperm.xlu1 %1470, %v909_v36   ;;  %v950_v40 = vrot.slane %v942_v37, %v1734_v31  ;;  %1377 = vmatprep.subr.mxu0 %v1590_v38  ;;  %v577_v53 = vsub.s32 %v574_v46, %v1707_v20 }
  0xe6   : > { %v957_v42 = vrot.slane %v943_v32, %v1734_v31  ;;  %1381 = vmatprep.mubr.msk.f32.mxu0 %vm1592_vm1, %v1590_v38  ;;  %1378 = vmatpush3.msra.mxu0 %v1014_v43  ;;  %v582_v50 = vsub.s32 %v579_v47, %v1707_v20  ;;  %v589_v52 = vsub.s32 %v586_v48, %v1707_v20 }
  0xe7   : > { %1387 = vmatpush3.msra.mxu1 %v1015_v39  ;;  %1379 = vmatprep.subr.mxu0 %v1590_v38  ;;  %v596_v57 = vsub.s32 %v593_v51, %v1707_v20 }
  0xe8   : > { %v958_v44 = vcombine.low %v950_v40, %v957_v42  ;;  %1380 = vmatpush3.msra.mxu0 %v1013_v45  ;;  %1388 = vmatprep.subr.mxu1 %v1590_v38  ;;  %v220_v1 = vld [vmem:[#allocation2] sm:$0x1]  ;;  %v618_v16 = vld [vmem:[#allocation3] sm:$0x1] }
  0xe9   : > { %1389 = vmatpush3.msra.mxu1 %v1014_v43  ;;  %1392 = vmatprep.mubr.msk.f32.mxu1 %vm1592_vm1, %v1590_v38 }
  0xea   : > { %969 = vperm.xlu1 %1470, %v958_v44   ;;  %1390 = vmatprep.subr.mxu1 %v1590_v38 }
  0xeb   : > { %1395 = vmatprep.subr.mxu0 %v1590_v38  ;;  %1391 = vmatpush3.msra.mxu1 %v1013_v45 }
 0x141   : > { %v563_v55 = vpop.permute.xlu0 %562 }
 0x142   : > { %v578_v59 = vrot.slane %v563_v55, %v577_v53 }
 0x147   : > { %v566_v49 = vpop.permute.xlu1 %565 }
 0x148   : > { %v583_v56 = vrot.slane %v566_v49, %v582_v50 }
 0x14a   : > { %v585_v60 = vsel %vm584_vm2, %v583_v56, %v578_v59 }
 0x14b   : > { %v569_v54 = vpop.permute.xlu1 %568 }
 0x14c   : > { %v590_v58 = vrot.slane %v569_v54, %v589_v52 }
 0x14e   : > { %v592_v62 = vsel %vm591_vm3, %v590_v58, %v585_v60 }
 0x150   : > { %v572_v17 = vpop.permute.xlu1 %571 }
 0x151   : > { %v597_v61 = vrot.slane %v572_v17, %v596_v57 }
 0x153   : > { %v599_v63 = vsel %vm598_vm4, %v597_v61, %v592_v62 }
 0x154   : > { %v606_v0 = vrot.slane %v599_v63, %v1734_v31 }
 0x155   : > { %v961_v2 = vpop.permute.xlu1 %960 }
 0x156   : > { %v613_v3 = vrot.slane %v606_v0, %v1734_v31  ;;  %v974_v10 = vrot.slane %v961_v2, %v577_v53 }
 0x158   : > { %v615_v20 = vadd.f32 %v613_v3, %v220_v1 }
 0x15a   : > { %617 = vst.msk [vmem:[#allocation2] sm:$0x1] %vm209_vm0, %v615_v20 }
 0x15b   : > { %v964_v4 = vpop.permute.xlu1 %963 }
 0x15c   : > { %v978_v7 = vrot.slane %v964_v4, %v582_v50 }
 0x15e   : > { %v979_v12 = vsel %vm584_vm2, %v978_v7, %v974_v10 }
 0x160   : > { %v967_v5 = vpop.permute.xlu1 %966 }
 0x161   : > { %v1010_v6 = vld [vmem:[#allocation2] sm:$0x1]  ;;  %v983_v9 = vrot.slane %v967_v5, %v589_v52 }
 0x162   : > { %v1011_v8 = vmul.f32 0.00390625, %v1010_v6 }
 0x163   : > { %v984_v14 = vsel %vm591_vm3, %v983_v9, %v979_v12 }
 0x164   : > { %1382 = vmatmul.mubr.msk.f32.vlgmr.msra.gmra.mxu0 %vm1018_vm5, %v1011_v8 }
 0x165   : > { %v970_v11 = vpop.permute.xlu1 %969  ;;  %1397 = vmatprep.mubr.msk.f32.mxu0 %vm1592_vm1, %v1590_v38  ;;  %1396 = vmatpush3.msk.msra.mxu0 %vm1172_vm6, %v1017_v21 }
 0x166   : > { %v988_v13 = vrot.slane %v970_v11, %v596_v57 }
 0x168   : > { %v989_v22 = vsel %vm598_vm4, %v988_v13, %v984_v14 }
 0x169   : > { %v996_v15 = vrot.slane %v989_v22, %v1734_v31 }
 0x16b   : > { %v1003_v18 = vrot.slane %v996_v15, %v1734_v31 }
 0x16d   : > { %v1005_v23 = vmax.f32 %v618_v16, %v1003_v18 }
 0x16f   : > { %1006 = vst.msk [vmem:[#allocation3] sm:$0x1] %vm209_vm0, %v1005_v23 }
 0x176   : > { %v1012_v19 = vld [vmem:[#allocation3] sm:$0x1] }
 0x177   : > { %1393 = vmatmul.mubr.msk.f32.vlgmr.msra.gmra.mxu1 %vm1018_vm5, %v1012_v19 }
 0x224   : > { %v1088_v30 = vpop.f32.mrf.mxu0 }
 0x225   : > { %v1092_v25 = vmax.f32 %v1088_v30, 0.0 }
 0x226   : > { %v1383_v33 = vpop.f32.mrf.mxu0 }
 0x237   : > { %v1162_v24 = vpop.f32.mrf.mxu1 }
 0x238   : > { %v1166_v34 = vmax.f32 %v1162_v24, 0.0 }
 0x239   : > { %v1394_v31 = vpop.f32.mrf.mxu1 }
 0x23a   : > { %v1167_v35 = vadd.f32 %v1166_v34, %v1092_v25 }
 0x23c   : > { %1398 = vmatmul.mubr.msk.f32.vlgmr.msra.gmra.mxu0 %vm1168_vm7, %v1167_v35 }
 0x2fc   : > { %v1242_v26 = vpop.f32.mrf.mxu0 }
 0x2fd   : > { %v1356_v27 = vmul.f32 -1.442695, %v1242_v26 }
 0x2fe   : > { %v1399_v28 = vpop.f32.mrf.mxu0 }
 0x2ff   : > { %1471 = vpow2.f32 %v1356_v27 }
 0x30c   : > { %v1472_v29 = vpop.eup %1471 }
 0x30d   : > { %v1249_v36 = vadd.f32 1.0, %v1472_v29 }
 0x30f   : > { %1473 = vrcp.f32 %v1249_v36 }
 0x31c   : > { %v1474_v37 = vpop.eup %1473 }
 0x31d   : > { %1252 = vst.msk [vmem:[%s203_s22] sm:$0x1] %vm209_vm0, %v1474_v37 }
 0x31e   : > { %1516 = shalt.err (!%p1513_p6)
}
 0x31f   : > { %s1517_s8 = scalar_lea.hbm %s1905_s4, 16  ;;  %s1521_s10 = scalar_lea.hbm %s1951_s3, 32 }
 0x320   : > { %p1518_p7 = scmp.ne.s32.totalorder %s1905_s4, %s1517_s8  ;;  %p1522_p13 = scmp.lt.s32.totalorder %s1905_s4, %s1951_s3 }
 0x321   : > { %p1523_p2 = scmp.lt.s32.totalorder %s1521_s10, %s1517_s8 }
 0x322   : > { %p1519_p10 = pnand %p1518_p7, %p1665_p9 }
 0x323   : > { %p1524_p8 = por %p1523_p2, %p1522_p13 }
 0x324   : > { %p1520_p4 = pneg %p1519_p10 }
 0x326   : > { %p1525_p12 = pnand %p1524_p8, %p1520_p4 }
 0x328   : > { %1528 = shalt.err (!%p1525_p12)
}
 0x329   : > { %1402 = dma.vmem_to_hbm [thread:$0]  (%p1665_p9), %s1267_s23, 16, %s1905_s4, %s1254_s24  }
 0x32a PF: > { %s1278_s19 = sand.u32 1, %s1563_s12   ;;  %p1957_p0 = scmp.ge.s32.totalorder %s1583_s17, 2 }
 0x32b   : > { %s1279_s21 = scalar_lea.sflag [#allocation6], %s1278_s19 }
 0x32c   : > { %p1409_p1 = pnand %p1957_p0, %p1672_p11 }
 0x32e   : > { %p1410_p3 = pneg %p1409_p1 }
 0x330   : > { %1558 = dma.done.wait (%p1410_p3), %s1279_s21, 16  }
 0x331   : > { %1560 = vsyncadd (%p1410_p3), %s1279_s21, 4294967280  ;;  %s19_s17 = sadd.s32 1, %s1583_s17   ;;  %s1958_s12 = smov %s1567_s13 }
 0x332   : > { %p16_p5 = scmp.ge.s32.totalorder %s19_s17, 4   ;;  %s1959_s13 = smov %s1571_s14 }
 0x333   : > { %s1960_s14 = smov %s1670_s26  ;;  %s1961_s15 = smov %s1579_s16 }
 0x334   : > { %s1962_s16 = smov %s1964_s20  ;;  %18 = sbr.rel (!%p16_p5) target bundleno = 6 (0x6), region = 85 }
 0x339   :  { %1283 = vsyncpa [#allocation5], 1 }
 0x33a   :  { %1285 = vsyncpa [#allocation5 + $0x1], 1 }
 0x33b   :  { %1286 = vsyncpa [#allocation6], 1 }
 0x33c   :  { %1288 = vsyncpa [#allocation6 + $0x1], 1 }

</bundles_post_ra>
